<compile_context>
chip_gen: v7x
topology: tpu7x:2x2x1
jax: 0.10.0
libtpu: 0.0.40
codegen_flags: <defaults>
</compile_context>

<pallas_src>
import functools
from types import SimpleNamespace

import numpy as np
import jax
import jax.numpy as jnp
from jax.experimental import pallas as pl
from jax.experimental.pallas import tpu as pltpu

LN_EPS = 1e-5
MASK_FILL = -1000000000.0
WEIGHT_DTYPE = jnp.bfloat16

# row indices inside the packed [H, R, 8, D] per-block vector slab
_B1, _G1, _BE1, _B2, _G2, _BE2 = 0, 1, 2, 3, 4, 5


def _round_up(x, m):
    return (x + m - 1) // m * m


# ------------------------- Pallas kernel (hot path) -------------------------
def policy_head_kernel(*refs, apply_mask: bool):
    """Grid = (H, R).  One residual block per grid step; output emitted at r==R-1."""
    if apply_mask:
        (x_ref, w1_ref, w2_ref, vec_ref, wo_ref, bo_ref, mask_ref,
         out_ref, x_sc) = refs
    else:
        (x_ref, w1_ref, w2_ref, vec_ref, wo_ref, bo_ref,
         out_ref, x_sc) = refs
        mask_ref = None

    r = pl.program_id(1)
    last_r = pl.num_programs(1) - 1

    # (re)load the shared embedding into the f32 activation scratch for this head
    @pl.when(r == 0)
    def _():
        x_sc[...] = x_ref[...].astype(jnp.float32)

    def layer_norm(h, g, b):
        mu = jnp.mean(h, axis=-1, keepdims=True)
        var = jnp.mean(jnp.square(h - mu), axis=-1, keepdims=True)
        return (h - mu) * jax.lax.rsqrt(var + LN_EPS) * g + b

    x = x_sc[...]                       # (Bp, D) f32 carried activation
    w1 = w1_ref[0, 0]                   # (D, D) bf16
    w2 = w2_ref[0, 0]                   # (D, D) bf16
    vec = vec_ref[0, 0]                 # (8, D) f32 packed per-block vectors

    # ResFCBlock2: fc1 = Linear + LN + ReLU ; fc2 = Linear + LN ; ReLU(out + x)
    h = jnp.dot(x.astype(w1.dtype), w1, preferred_element_type=jnp.float32)
    h = h + vec[_B1:_B1 + 1]
    h = jnp.maximum(layer_norm(h, vec[_G1:_G1 + 1], vec[_BE1:_BE1 + 1]), 0.0)
    h = jnp.dot(h.astype(w2.dtype), w2, preferred_element_type=jnp.float32)
    h = h + vec[_B2:_B2 + 1]
    h = layer_norm(h, vec[_G2:_G2 + 1], vec[_BE2:_BE2 + 1])
    x_new = jnp.maximum(h + x, 0.0)
    x_sc[...] = x_new

    # output projection + masked_fill, only on the last residual block
    @pl.when(r == last_r)
    def _():
        wo = wo_ref[0]                                          # (D, O_pad) bf16
        out = jnp.dot(x_new.astype(wo.dtype), wo,
                      preferred_element_type=jnp.float32) + bo_ref[0]
        if apply_mask:
            out = jnp.where(mask_ref[0] != 0, jnp.float32(MASK_FILL), out)
        out_ref[0] = out.astype(out_ref.dtype)


def run_policy_heads(x_pad, p, mask_slab=None):
    """One fused pallas_call over all heads.  Returns an [H, Bp, O_pad] f32 slab."""
    Bp, D = x_pad.shape
    H, R = p["w1"].shape[:2]
    Opad = p["wo"].shape[-1]
    apply_mask = mask_slab is not None

    in_arrays = [x_pad, p["w1"], p["w2"], p["vec"], p["wo"], p["bo"]]
    in_specs = [
        pl.BlockSpec((Bp, D), lambda h, r: (0, 0)),                 # embedding (fetched once)
        pl.BlockSpec((1, 1, D, D), lambda h, r: (h, r, 0, 0)),      # w1, streamed per block
        pl.BlockSpec((1, 1, D, D), lambda h, r: (h, r, 0, 0)),      # w2, streamed per block
        pl.BlockSpec((1, 1, 8, D), lambda h, r: (h, r, 0, 0)),      # packed bias/LN vectors
        pl.BlockSpec((1, D, Opad), lambda h, r: (h, 0, 0)),         # output weights (per head)
        pl.BlockSpec((1, 1, Opad), lambda h, r: (h, 0, 0)),         # output bias (per head)
    ]
    if apply_mask:
        in_arrays.append(mask_slab)
        in_specs.append(pl.BlockSpec((1, Bp, Opad), lambda h, r: (h, 0, 0)))

    # explicit VMEM budget (double-buffered inputs + resident output + scratch, with margin)
    per_iter = (Bp * D * 4 + 2 * (D * D * 2) + 8 * D * 4 + D * Opad * 2
                + Opad * 4 + Bp * Opad)
    vmem_limit = int(min(max(4 * (2 * per_iter + Bp * Opad * 4 + Bp * D * 4),
                             16 * 1024 * 1024), 100 * 1024 * 1024))

    kernel = functools.partial(policy_head_kernel, apply_mask=apply_mask)
    return pl.pallas_call(
        kernel,
        out_shape=jax.ShapeDtypeStruct((H, Bp, Opad), jnp.float32),
        grid_spec=pltpu.PrefetchScalarGridSpec(
            num_scalar_prefetch=0,
            grid=(H, R),
            in_specs=in_specs,
            out_specs=pl.BlockSpec((1, Bp, Opad), lambda h, r: (h, 0, 0)),
            scratch_shapes=[pltpu.VMEM((Bp, D), jnp.float32)],
        ),
        compiler_params=pltpu.CompilerParams(
            dimension_semantics=("parallel", "arbitrary"),
            vmem_limit_bytes=vmem_limit,
        ),
    )(*in_arrays)


# ------------------------------ parameter init ------------------------------
def init_action_head_params(key, D, R, O):
    ks = jax.random.split(key, 10)
    s = 1.0 / np.sqrt(D)
    return dict(
        w1=jax.random.normal(ks[0], (R, D, D), jnp.float32) * s,
        b1=0.05 * jax.random.normal(ks[1], (R, D), jnp.float32),
        g1=1.0 + 0.05 * jax.random.normal(ks[2], (R, D), jnp.float32),
        be1=0.05 * jax.random.normal(ks[3], (R, D), jnp.float32),
        w2=jax.random.normal(ks[4], (R, D, D), jnp.float32) * s,
        b2=0.05 * jax.random.normal(ks[5], (R, D), jnp.float32),
        g2=1.0 + 0.05 * jax.random.normal(ks[6], (R, D), jnp.float32),
        be2=0.05 * jax.random.normal(ks[7], (R, D), jnp.float32),
        wo=jax.random.normal(ks[8], (D, O), jnp.float32) * s,
        bo=0.05 * jax.random.normal(ks[9], (O,), jnp.float32),
    )


def stack_head_params(per_head, head_dims, D, R, Opad, weight_dtype=WEIGHT_DTYPE):
    """Stack per-head params into the fused-kernel layout."""
    H = len(per_head)
    w1 = jnp.stack([p["w1"] for p in per_head]).astype(weight_dtype)     # [H,R,D,D]
    w2 = jnp.stack([p["w2"] for p in per_head]).astype(weight_dtype)     # [H,R,D,D]
    vec = jnp.zeros((H, R, 8, D), jnp.float32)                           # packed vectors
    wo = jnp.zeros((H, D, Opad), weight_dtype)                           # lane-dense output
    bo = jnp.zeros((H, 1, Opad), jnp.float32)
    for i, (p, O) in enumerate(zip(per_head, head_dims)):
        vec = vec.at[i, :, _B1].set(p["b1"])
        vec = vec.at[i, :, _G1].set(p["g1"])
        vec = vec.at[i, :, _BE1].set(p["be1"])
        vec = vec.at[i, :, _B2].set(p["b2"])
        vec = vec.at[i, :, _G2].set(p["g2"])
        vec = vec.at[i, :, _BE2].set(p["be2"])
        wo = wo.at[i, :, :O].set(p["wo"].astype(weight_dtype))
        bo = bo.at[i, 0, :O].set(p["bo"])
    return dict(w1=w1, w2=w2, vec=vec, wo=wo, bo=bo)


# ---------------------------- pure-JAX reference ----------------------------
def policy_head_ref(embedding, stacked, action_list, action_dim, mask=None):
    def ln(h, g, b):
        mu = h.mean(-1, keepdims=True)
        var = ((h - mu) ** 2).mean(-1, keepdims=True)
        return (h - mu) * jax.lax.rsqrt(var + LN_EPS) * g + b

    H, R = stacked["w1"].shape[:2]
    res = {}
    for hi, head in enumerate(action_list):
        x = embedding.astype(jnp.float32)
        for r in range(R):
            resid = x
            w1 = stacked["w1"][hi, r]
            h = jnp.dot(x.astype(w1.dtype), w1, preferred_element_type=jnp.float32)
            h = h + stacked["vec"][hi, r, _B1][None]
            h = jnp.maximum(
                ln(h, stacked["vec"][hi, r, _G1][None], stacked["vec"][hi, r, _BE1][None]), 0.0)
            w2 = stacked["w2"][hi, r]
            h = jnp.dot(h.astype(w2.dtype), w2, preferred_element_type=jnp.float32)
            h = h + stacked["vec"][hi, r, _B2][None]
            h = ln(h, stacked["vec"][hi, r, _G2][None], stacked["vec"][hi, r, _BE2][None])
            x = jnp.maximum(h + resid, 0.0)
        O = action_dim[head]
        wo = stacked["wo"][hi, :, :O]
        out = jnp.dot(x.astype(wo.dtype), wo, preferred_element_type=jnp.float32)
        out = out + stacked["bo"][hi, 0, :O][None]
        if mask is not None:
            out = jnp.where(mask[head] != 0, jnp.float32(MASK_FILL), out)
        res[head] = out
    return res


# -------------------------------- PolicyHead --------------------------------
class PolicyHeadPallas:
    def __init__(self, cfg, key):
        self.cfg = cfg.model.policy
        self.action_list = list(cfg.agent.action_heads)
        self.action_dim = {}
        for head in self.action_list:
            self.action_dim[head] = sum(
                len(cfg.agent.actions_range[_]) for _ in cfg.agent.action_head_sub[head]
            )
        D, R = self.cfg.embedding_dim, self.cfg.res_num
        self.H = len(self.action_list)
        self.Opad = _round_up(max(self.action_dim.values()), 128)   # lane-dense output slab

        keys = jax.random.split(key, self.H)
        per_head = [init_action_head_params(k, D, R, self.action_dim[h])
                    for k, h in zip(keys, self.action_list)]
        head_dims = [self.action_dim[h] for h in self.action_list]
        self.stacked = stack_head_params(per_head, head_dims, D, R, self.Opad)

    def __call__(self, embedding, mask=None):
        B, D = embedding.shape
        Bp = _round_up(max(B, 8), 8)                       # pad batch to sublane multiple
        x_pad = jnp.zeros((Bp, D), jnp.float32).at[:B].set(embedding.astype(jnp.float32))

        mask_slab = None
        if mask is not None:
            mask_slab = jnp.zeros((self.H, Bp, self.Opad), jnp.int8)
            for hi, head in enumerate(self.action_list):
                mask_slab = mask_slab.at[hi, :B, :self.action_dim[head]].set(
                    mask[head].astype(jnp.int8))

        out_slab = run_policy_heads(x_pad, self.stacked, mask_slab)
        res = {}
        for hi, head in enumerate(self.action_list):
            res[head] = out_slab[hi, :B, :self.action_dim[head]]
        return res

    def reference(self, embedding, mask=None):
        return policy_head_ref(embedding, self.stacked, self.action_list,
                               self.action_dim, mask=mask)


# ------------------------------------ main -----------------------------------
if __name__ == "__main__":
    cfg = SimpleNamespace(
        model=SimpleNamespace(policy=SimpleNamespace(embedding_dim=32, res_num=2)),
        agent=SimpleNamespace(
            action_heads=["move", "target"],
            action_head_sub={"move": ["move_x", "move_y"], "target": ["target_unit"]},
            actions_range={
                "move_x": list(range(3)),
                "move_y": list(range(3)),
                "target_unit": list(range(9)),
            },
        ),
    )

    key = jax.random.PRNGKey(0)
    k_param, k_x, k_m1, k_m2 = jax.random.split(key, 4)

    model = PolicyHeadPallas(cfg, k_param)

    B = 4
    embedding = jax.random.normal(k_x, (B, cfg.model.policy.embedding_dim), jnp.float32)
    mask = {
        "move": (jax.random.uniform(k_m1, (B, model.action_dim["move"])) < 0.25).astype(jnp.int32),
        "target": (jax.random.uniform(k_m2, (B, model.action_dim["target"])) < 0.25).astype(jnp.int32),
    }

    # masked forward
    out = model(embedding, mask=mask)
    out = jax.tree_util.tree_map(jax.block_until_ready, out)
    ref = model.reference(embedding, mask=mask)
    for head in cfg.agent.action_heads:
        np.testing.assert_allclose(np.asarray(out[head]), np.asarray(ref[head]),
                                   rtol=1e-2, atol=1e-2)

    # no-mask forward (separate kernel variant without the mask DMA)
    out_nm = model(embedding, mask=None)
    out_nm = jax.tree_util.tree_map(jax.block_until_ready, out_nm)
    ref_nm = model.reference(embedding, mask=None)
    for head in cfg.agent.action_heads:
        np.testing.assert_allclose(np.asarray(out_nm[head]), np.asarray(ref_nm[head]),
                                   rtol=1e-2, atol=1e-2)

    print("KERNEL_OK")
</pallas_src>

<mosaic_0001>
module attributes {stable_mosaic.version = 11 : i64} {
  func.func @policy_head_kernel(%arg0: i32, %arg1: i32, %arg2: memref<8x32xf32, #tpu.memory_space<vmem>>, %arg3: memref<1x1x32x32xbf16, #tpu.memory_space<vmem>>, %arg4: memref<1x1x32x32xbf16, #tpu.memory_space<vmem>>, %arg5: memref<1x1x8x32xf32, #tpu.memory_space<vmem>>, %arg6: memref<1x32x128xbf16, #tpu.memory_space<vmem>>, %arg7: memref<1x1x128xf32, #tpu.memory_space<vmem>>, %arg8: memref<1x8x128xi8, #tpu.memory_space<vmem>>, %arg9: memref<1x8x128xf32, #tpu.memory_space<vmem>>, %arg10: memref<8x32xf32, #tpu.memory_space<vmem>>) attributes {dimension_semantics = [#tpu.dimension_semantics<parallel>, #tpu.dimension_semantics<arbitrary>], iteration_bounds = array<i64: 2, 2>, scalar_prefetch = 0 : i64, scratch_operands = 1 : i64, tpu.core_type = #tpu.core_type<tc>, window_params = [{pipeline_mode = #tpu.pipeline_mode<synchronous>, transform_indices = @transform_0, window_bounds = array<i64: 8, 32>}, {transform_indices = @transform_1, window_bounds = array<i64: 1, 1, 32, 32>}, {transform_indices = @transform_2, window_bounds = array<i64: 1, 1, 32, 32>}, {transform_indices = @transform_3, window_bounds = array<i64: 1, 1, 8, 32>}, {transform_indices = @transform_4, window_bounds = array<i64: 1, 32, 128>}, {transform_indices = @transform_5, window_bounds = array<i64: 1, 1, 128>}, {transform_indices = @transform_6, window_bounds = array<i64: 1, 8, 128>}, {transform_indices = @transform_7, window_bounds = array<i64: 1, 8, 128>}]} {
    %c0_i32 = arith.constant 0 : i32
    %0 = arith.cmpi eq, %arg1, %c0_i32 : i32
    %1 = arith.extui %0 : i1 to i32
    %c0_i32_0 = arith.constant 0 : i32
    %2 = arith.cmpi ne, %1, %c0_i32_0 : i32
    scf.if %2 {
      %c0_30 = arith.constant 0 : index
      %c0_31 = arith.constant 0 : index
      %77 = vector.load %arg2[%c0_30, %c0_31] : memref<8x32xf32, #tpu.memory_space<vmem>>, vector<8x32xf32>
      %c0_32 = arith.constant 0 : index
      %c0_33 = arith.constant 0 : index
      %78 = vector.load %arg10[%c0_32, %c0_33] : memref<8x32xf32, #tpu.memory_space<vmem>>, vector<8x32xf32>
      tpu.vector_store %arg10[%c0_32, %c0_33], %77 {strides = array<i32>} : memref<8x32xf32, #tpu.memory_space<vmem>>, vector<8x32xf32>,
    } else {
    }
    %c0 = arith.constant 0 : index
    %c0_1 = arith.constant 0 : index
    %3 = vector.load %arg10[%c0, %c0_1] : memref<8x32xf32, #tpu.memory_space<vmem>>, vector<8x32xf32>
    %c0_2 = arith.constant 0 : index
    %c0_3 = arith.constant 0 : index
    %c0_4 = arith.constant 0 : index
    %c0_5 = arith.constant 0 : index
    %4 = vector.load %arg3[%c0_2, %c0_3, %c0_4, %c0_5] : memref<1x1x32x32xbf16, #tpu.memory_space<vmem>>, vector<1x1x32x32xbf16>
    %5 = vector.shape_cast %4 : vector<1x1x32x32xbf16> to vector<32x32xbf16>
    %c0_6 = arith.constant 0 : index
    %c0_7 = arith.constant 0 : index
    %c0_8 = arith.constant 0 : index
    %c0_9 = arith.constant 0 : index
    %6 = vector.load %arg4[%c0_6, %c0_7, %c0_8, %c0_9] : memref<1x1x32x32xbf16, #tpu.memory_space<vmem>>, vector<1x1x32x32xbf16>
    %7 = vector.shape_cast %6 : vector<1x1x32x32xbf16> to vector<32x32xbf16>
    %c0_10 = arith.constant 0 : index
    %c0_11 = arith.constant 0 : index
    %c0_12 = arith.constant 0 : index
    %c0_13 = arith.constant 0 : index
    %8 = vector.load %arg5[%c0_10, %c0_11, %c0_12, %c0_13] : memref<1x1x8x32xf32, #tpu.memory_space<vmem>>, vector<1x1x8x32xf32>
    %9 = vector.shape_cast %8 : vector<1x1x8x32xf32> to vector<8x32xf32>
    %10 = arith.truncf %3 : vector<8x32xf32> to vector<8x32xbf16>
    %cst = arith.constant dense<0.000000e+00> : vector<8x32xf32>
    %11 = tpu.matmul %10, %5, %cst {dimension_numbers = #tpu.dot_dimension_numbers<[1], [0], [0], [1], [0, 0, 1, 1], [], []>} : vector<8x32xbf16>, vector<32x32xbf16>, vector<8x32xf32> -> vector<8x32xf32>
    %12 = vector.extract_strided_slice %9 {offsets = [0, 0], sizes = [1, 32], strides = [1, 1]} : vector<8x32xf32> to vector<1x32xf32>
    %13 = vector.broadcast %12 : vector<1x32xf32> to vector<8x32xf32>
    %14 = arith.addf %11, %13 : vector<8x32xf32>
    %15 = vector.extract_strided_slice %9 {offsets = [1, 0], sizes = [1, 32], strides = [1, 1]} : vector<8x32xf32> to vector<1x32xf32>
    %16 = vector.extract_strided_slice %9 {offsets = [2, 0], sizes = [1, 32], strides = [1, 1]} : vector<8x32xf32> to vector<1x32xf32>
    %cst_14 = arith.constant dense<0.000000e+00> : vector<8xf32>
    %17 = vector.multi_reduction <add>, %14, %cst_14 [1] : vector<8x32xf32> to vector<8xf32>
    %18 = vector.shape_cast %17 : vector<8xf32> to vector<8x1xf32>
    %cst_15 = arith.constant 3.200000e+01 : f32
    %19 = vector.broadcast %cst_15 : f32 to vector<8x1xf32>
    %20 = arith.divf %18, %19 : vector<8x1xf32>
    %21 = vector.broadcast %20 : vector<8x1xf32> to vector<8x32xf32>
    %22 = arith.subf %14, %21 : vector<8x32xf32>
    %23 = arith.mulf %22, %22 : vector<8x32xf32>
    %cst_16 = arith.constant dense<0.000000e+00> : vector<8xf32>
    %24 = vector.multi_reduction <add>, %23, %cst_16 [1] : vector<8x32xf32> to vector<8xf32>
    %25 = vector.shape_cast %24 : vector<8xf32> to vector<8x1xf32>
    %cst_17 = arith.constant 3.200000e+01 : f32
    %26 = vector.broadcast %cst_17 : f32 to vector<8x1xf32>
    %27 = arith.divf %25, %26 : vector<8x1xf32>
    %28 = vector.broadcast %20 : vector<8x1xf32> to vector<8x32xf32>
    %29 = arith.subf %14, %28 : vector<8x32xf32>
    %cst_18 = arith.constant 9.99999974E-6 : f32
    %30 = vector.broadcast %cst_18 : f32 to vector<8x1xf32>
    %31 = arith.addf %27, %30 : vector<8x1xf32>
    %32 = math.rsqrt %31 : vector<8x1xf32>
    %33 = vector.broadcast %32 : vector<8x1xf32> to vector<8x32xf32>
    %34 = arith.mulf %29, %33 : vector<8x32xf32>
    %35 = vector.broadcast %15 : vector<1x32xf32> to vector<8x32xf32>
    %36 = arith.mulf %34, %35 : vector<8x32xf32>
    %37 = vector.broadcast %16 : vector<1x32xf32> to vector<8x32xf32>
    %38 = arith.addf %36, %37 : vector<8x32xf32>
    %cst_19 = arith.constant 0.000000e+00 : f32
    %39 = vector.broadcast %cst_19 : f32 to vector<8x32xf32>
    %40 = arith.maximumf %38, %39 : vector<8x32xf32>
    %41 = arith.truncf %40 : vector<8x32xf32> to vector<8x32xbf16>
    %cst_20 = arith.constant dense<0.000000e+00> : vector<8x32xf32>
    %42 = tpu.matmul %41, %7, %cst_20 {dimension_numbers = #tpu.dot_dimension_numbers<[1], [0], [0], [1], [0, 0, 1, 1], [], []>} : vector<8x32xbf16>, vector<32x32xbf16>, vector<8x32xf32> -> vector<8x32xf32>
    %43 = vector.extract_strided_slice %9 {offsets = [3, 0], sizes = [1, 32], strides = [1, 1]} : vector<8x32xf32> to vector<1x32xf32>
    %44 = vector.broadcast %43 : vector<1x32xf32> to vector<8x32xf32>
    %45 = arith.addf %42, %44 : vector<8x32xf32>
    %46 = vector.extract_strided_slice %9 {offsets = [4, 0], sizes = [1, 32], strides = [1, 1]} : vector<8x32xf32> to vector<1x32xf32>
    %47 = vector.extract_strided_slice %9 {offsets = [5, 0], sizes = [1, 32], strides = [1, 1]} : vector<8x32xf32> to vector<1x32xf32>
    %cst_21 = arith.constant dense<0.000000e+00> : vector<8xf32>
    %48 = vector.multi_reduction <add>, %45, %cst_21 [1] : vector<8x32xf32> to vector<8xf32>
    %49 = vector.shape_cast %48 : vector<8xf32> to vector<8x1xf32>
    %cst_22 = arith.constant 3.200000e+01 : f32
    %50 = vector.broadcast %cst_22 : f32 to vector<8x1xf32>
    %51 = arith.divf %49, %50 : vector<8x1xf32>
    %52 = vector.broadcast %51 : vector<8x1xf32> to vector<8x32xf32>
    %53 = arith.subf %45, %52 : vector<8x32xf32>
    %54 = arith.mulf %53, %53 : vector<8x32xf32>
    %cst_23 = arith.constant dense<0.000000e+00> : vector<8xf32>
    %55 = vector.multi_reduction <add>, %54, %cst_23 [1] : vector<8x32xf32> to vector<8xf32>
    %56 = vector.shape_cast %55 : vector<8xf32> to vector<8x1xf32>
    %cst_24 = arith.constant 3.200000e+01 : f32
    %57 = vector.broadcast %cst_24 : f32 to vector<8x1xf32>
    %58 = arith.divf %56, %57 : vector<8x1xf32>
    %59 = vector.broadcast %51 : vector<8x1xf32> to vector<8x32xf32>
    %60 = arith.subf %45, %59 : vector<8x32xf32>
    %cst_25 = arith.constant 9.99999974E-6 : f32
    %61 = vector.broadcast %cst_25 : f32 to vector<8x1xf32>
    %62 = arith.addf %58, %61 : vector<8x1xf32>
    %63 = math.rsqrt %62 : vector<8x1xf32>
    %64 = vector.broadcast %63 : vector<8x1xf32> to vector<8x32xf32>
    %65 = arith.mulf %60, %64 : vector<8x32xf32>
    %66 = vector.broadcast %46 : vector<1x32xf32> to vector<8x32xf32>
    %67 = arith.mulf %65, %66 : vector<8x32xf32>
    %68 = vector.broadcast %47 : vector<1x32xf32> to vector<8x32xf32>
    %69 = arith.addf %67, %68 : vector<8x32xf32>
    %70 = arith.addf %69, %3 : vector<8x32xf32>
    %cst_26 = arith.constant 0.000000e+00 : f32
    %71 = vector.broadcast %cst_26 : f32 to vector<8x32xf32>
    %72 = arith.maximumf %70, %71 : vector<8x32xf32>
    %c0_27 = arith.constant 0 : index
    %c0_28 = arith.constant 0 : index
    %73 = vector.load %arg10[%c0_27, %c0_28] : memref<8x32xf32, #tpu.memory_space<vmem>>, vector<8x32xf32>
    tpu.vector_store %arg10[%c0_27, %c0_28], %72 {strides = array<i32>} : memref<8x32xf32, #tpu.memory_space<vmem>>, vector<8x32xf32>,
    %c1_i32 = arith.constant 1 : i32
    %74 = arith.cmpi eq, %arg1, %c1_i32 : i32
    %75 = arith.extui %74 : i1 to i32
    %c0_i32_29 = arith.constant 0 : i32
    %76 = arith.cmpi ne, %75, %c0_i32_29 : i32
    scf.if %76 {
      %c0_30 = arith.constant 0 : index
      %c0_31 = arith.constant 0 : index
      %c0_32 = arith.constant 0 : index
      %77 = vector.load %arg6[%c0_30, %c0_31, %c0_32] : memref<1x32x128xbf16, #tpu.memory_space<vmem>>, vector<1x32x128xbf16>
      %78 = vector.shape_cast %77 : vector<1x32x128xbf16> to vector<32x128xbf16>
      %79 = arith.truncf %72 : vector<8x32xf32> to vector<8x32xbf16>
      %cst_33 = arith.constant dense<0.000000e+00> : vector<8x128xf32>
      %80 = tpu.matmul %79, %78, %cst_33 {dimension_numbers = #tpu.dot_dimension_numbers<[1], [0], [0], [1], [0, 0, 1, 1], [], []>} : vector<8x32xbf16>, vector<32x128xbf16>, vector<8x128xf32> -> vector<8x128xf32>
      %c0_34 = arith.constant 0 : index
      %c0_35 = arith.constant 0 : index
      %c0_36 = arith.constant 0 : index
      %81 = vector.load %arg7[%c0_34, %c0_35, %c0_36] : memref<1x1x128xf32, #tpu.memory_space<vmem>>, vector<1x1x128xf32>
      %82 = vector.shape_cast %81 : vector<1x1x128xf32> to vector<1x128xf32>
      %83 = vector.broadcast %82 : vector<1x128xf32> to vector<8x128xf32>
      %84 = arith.addf %80, %83 : vector<8x128xf32>
      %c0_37 = arith.constant 0 : index
      %c0_38 = arith.constant 0 : index
      %c0_39 = arith.constant 0 : index
      %85 = vector.load %arg8[%c0_37, %c0_38, %c0_39] : memref<1x8x128xi8, #tpu.memory_space<vmem>>, vector<1x8x128xi8>
      %86 = vector.shape_cast %85 : vector<1x8x128xi8> to vector<8x128xi8>
      %c0_i8 = arith.constant 0 : i8
      %87 = vector.broadcast %c0_i8 : i8 to vector<8x128xi8>
      %88 = arith.cmpi ne, %86, %87 : vector<8x128xi8>
      %cst_40 = arith.constant -1.000000e+09 : f32
      %89 = vector.broadcast %cst_40 : f32 to vector<8x128xf32>
      %90 = arith.select %88, %89, %84 : vector<8x128xi1>, vector<8x128xf32>
      %c0_41 = arith.constant 0 : index
      %c0_42 = arith.constant 0 : index
      %c0_43 = arith.constant 0 : index
      %91 = vector.load %arg9[%c0_41, %c0_42, %c0_43] : memref<1x8x128xf32, #tpu.memory_space<vmem>>, vector<1x8x128xf32>
      %92 = vector.shape_cast %91 : vector<1x8x128xf32> to vector<8x128xf32>
      %93 = vector.shape_cast %90 : vector<8x128xf32> to vector<1x8x128xf32>
      tpu.vector_store %arg9[%c0_41, %c0_42, %c0_43], %93 {strides = array<i32>} : memref<1x8x128xf32, #tpu.memory_space<vmem>>, vector<1x8x128xf32>,
    } else {
    }
    return
  }
  func.func @transform_0(%arg0: i32, %arg1: i32) -> (i32, i32) {
    %c0_i32 = arith.constant 0 : i32
    %c0_i32_0 = arith.constant 0 : i32
    %c0_i32_1 = arith.constant 0 : i32
    return %c0_i32, %c0_i32_0 : i32, i32
  }
  func.func @transform_1(%arg0: i32, %arg1: i32) -> (i32, i32, i32, i32) {
    %c0_i32 = arith.constant 0 : i32
    %c0_i32_0 = arith.constant 0 : i32
    %c0_i32_1 = arith.constant 0 : i32
    return %arg0, %arg1, %c0_i32, %c0_i32_0 : i32, i32, i32, i32
  }
  func.func @transform_2(%arg0: i32, %arg1: i32) -> (i32, i32, i32, i32) {
    %c0_i32 = arith.constant 0 : i32
    %c0_i32_0 = arith.constant 0 : i32
    %c0_i32_1 = arith.constant 0 : i32
    return %arg0, %arg1, %c0_i32, %c0_i32_0 : i32, i32, i32, i32
  }
  func.func @transform_3(%arg0: i32, %arg1: i32) -> (i32, i32, i32, i32) {
    %c0_i32 = arith.constant 0 : i32
    %c0_i32_0 = arith.constant 0 : i32
    %c0_i32_1 = arith.constant 0 : i32
    return %arg0, %arg1, %c0_i32, %c0_i32_0 : i32, i32, i32, i32
  }
  func.func @transform_4(%arg0: i32, %arg1: i32) -> (i32, i32, i32) {
    %c0_i32 = arith.constant 0 : i32
    %c0_i32_0 = arith.constant 0 : i32
    %c0_i32_1 = arith.constant 0 : i32
    return %arg0, %c0_i32, %c0_i32_0 : i32, i32, i32
  }
  func.func @transform_5(%arg0: i32, %arg1: i32) -> (i32, i32, i32) {
    %c0_i32 = arith.constant 0 : i32
    %c0_i32_0 = arith.constant 0 : i32
    %c0_i32_1 = arith.constant 0 : i32
    return %arg0, %c0_i32, %c0_i32_0 : i32, i32, i32
  }
  func.func @transform_6(%arg0: i32, %arg1: i32) -> (i32, i32, i32) {
    %c0_i32 = arith.constant 0 : i32
    %c0_i32_0 = arith.constant 0 : i32
    %c0_i32_1 = arith.constant 0 : i32
    return %arg0, %c0_i32, %c0_i32_0 : i32, i32, i32
  }
  func.func @transform_7(%arg0: i32, %arg1: i32) -> (i32, i32, i32) {
    %c0_i32 = arith.constant 0 : i32
    %c0_i32_0 = arith.constant 0 : i32
    %c0_i32_1 = arith.constant 0 : i32
    return %arg0, %c0_i32, %c0_i32_0 : i32, i32, i32
  }
}

</mosaic_0001>

<bundles_post_ra>
// kernel: tpu_custom_call.1
= control target key start
LH: loop header
LB: loop body
LE: loop exit
PB: predicated region body
PF: predicated region fallthrough
CT: control target
= control target key end

     0   :  { %s1987_s0 = inlined_call_operand.hbm [shape: f32[8,32], index: 0, kind: input, shape index: {}]   ;;  %s1988_s1 = inlined_call_operand.hbm [shape: bf16[2,2,32,32], index: 1, kind: input, shape index: {}]   ;;  %s1989_s2 = inlined_call_operand.hbm [shape: bf16[2,2,32,32], index: 2, kind: input, shape index: {}]   ;;  %s1990_s3 = inlined_call_operand.hbm [shape: f32[2,2,8,32], index: 3, kind: input, shape index: {}]   ;;  %s1991_s4 = inlined_call_operand.hbm [shape: bf16[2,32,128], index: 4, kind: input, shape index: {}]   ;;  %s1992_s5 = inlined_call_operand.vmem [shape: f32[2,1,128], index: 5, kind: input, shape index: {}]   ;;  %s1993_s6 = inlined_call_operand.vmem [shape: s8[2,8,128], index: 6, kind: input, shape index: {}]   ;;  %s1994_s7 = inlined_call_operand.hbm [shape: f32[2,8,128], index: 7, kind: output, shape index: {}]  }
   0x1   :  { %2022 = sst [smem:[#allocation28_spill]] %s1987_s0 }
   0x2   :  { %2023 = sst [smem:[#allocation29_spill]] %s1988_s1 }
   0x3   :  { %2024 = sst [smem:[#allocation30_spill]] %s1989_s2 }
   0x4   :  { %2025 = sst [smem:[#allocation31_spill]] %s1990_s3 }
   0x5   :  { %2026 = sst [smem:[#allocation32_spill]] %s1991_s4 }
   0x6   :  { %2027 = sst [smem:[#allocation33_spill]] %s1992_s5 }
   0x7   :  { %2028 = sst [smem:[#allocation34_spill]] %s1993_s6 }
   0x8   :  { %2029 = sst [smem:[#allocation35_spill]] %s1994_s7 }
   0x9   :  { %12 = vsyncpa [#allocation4], 0 }
   0xa   :  { %13 = vsyncpa [#allocation7], 0 }
   0xb   :  { %15 = vsyncpa [#allocation7 + $0x1], 0 }
   0xc   :  { %16 = vsyncpa [#allocation10], 0 }
   0xd   :  { %18 = vsyncpa [#allocation10 + $0x1], 0 }
   0xe   :  { %19 = vsyncpa [#allocation5], 0 }
   0xf   :  { %21 = vsyncpa [#allocation5 + $0x1], 0  ;;  %s1504_s24 = smov 0   ;;  %s1506_s25 = smov 0  }
  0x10   :  { %s1508_s26 = smov 0   ;;  %s1510_s27 = smov 0  }
  0x11   :  { %s1512_s28 = smov 0   ;;  %s1514_s29 = smov 0  }
  0x12   :  { %s1516_s30 = smov 0   ;;  %s1518_s8 = smov 0  }
  0x13   :  { %s1520_s9 = smov 0   ;;  %s1522_s10 = smov 0  }
  0x14   :  { %s1524_s11 = smov 0  }
  0x15 LB: > { %2030 = sst [smem:[#allocation18_spill]] %s1409_s24  ;;  %s36_s12 = sadd.s32 1, %s1441_s9  ;;  %s1449_s11 = sphi %s1524_s11, %s27_s11   ;;  %s1445_s10 = sphi %s1522_s10, %s2102_s10   ;;  %s1441_s9 = sphi %s1520_s9, %s2094_s9   ;;  %s1437_s8 = sphi %s1518_s8, %s2101_s8   ;;  %s1433_s30 = sphi %s1516_s30, %s2093_s30   ;;  %s1429_s29 = sphi %s1514_s29, %s2100_s29   ;;  %s1425_s28 = sphi %s1512_s28, %s2099_s28   ;;  %s1421_s27 = sphi %s1510_s27, %s2098_s27   ;;  %s1417_s26 = sphi %s1508_s26, %s2097_s26   ;;  %s1413_s25 = sphi %s1506_s25, %s2096_s25   ;;  %s1409_s24 = sphi %s1504_s24, %s2089_s24  }
  0x16   : > { %2031 = sst [smem:[#allocation19_spill]] %s1413_s25  ;;  %s39_s13 = sadd.s32 1, %s1445_s10 }
  0x17   : > { %2032 = sst [smem:[#allocation20_spill]] %s1417_s26  ;;  %p37_p0 = scmp.ge.s32.totalorder %s36_s12, 2 }
  0x18   : > { %2033 = sst [smem:[#allocation21_spill]] %s1433_s30  ;;  %s69_s14 = sadd.s32 1, %s1429_s29 }
  0x19   : > { %2034 = sst [smem:[#allocation22_spill]] %s1437_s8  ;;  %p76_p1 = scmp.ne.s32.totalorder %s1429_s29, %s1425_s28 }
  0x1a   : > { %2035 = sst [smem:[#allocation23_spill]] %s1441_s9  ;;  %p2001_p2 = scmp.eq.s32.totalorder %s1449_s11, 0 }
  0x1b   : > { %s2104_s12 = smov (%p37_p0, %s36_s12), 0  ;;  %s2106_s13 = smov (!%p37_p0, %s39_s13), %s1445_s10 }
  0x1c   : > { %2036 = sst [smem:[#allocation24_spill]] %s2104_s12  ;;  %s65_s15 = ssub.s32 %s1441_s9, %s2104_s12 }
  0x1d   : > { %p1572_p3 = por %p2001_p2, %p76_p1  ;;  %p41_p4 = scmp.ge.s32.totalorder %s2106_s13, 2 }
  0x1e   : > { %p2000_p5 = scmp.lt.s32.totalorder %s1449_s11, 4  ;;  %s1998_s18 = sand.u32 1, %s1429_s29  }
  0x1f   : > { %s2108_s13 = smov (%p41_p4, %s2106_s13), 0  ;;  %s1587_s20 = sshll.u32 %s1998_s18, 4 }
  0x20   : > { %2038 = sst [smem:[#allocation25_spill]] %s2108_s13  ;;  %s1583_s19 = ssub.s32 %s1445_s10, %s2108_s13 }
  0x21   : > { %2039 = sst [smem:[#allocation26_spill]] %s1583_s19  ;;  %s66_s21 = sor.u32 %s65_s15, %s1583_s19 }
  0x22   : > { %p67_p7 = scmp.eq.s32.totalorder %s66_s21, 0  ;;  %s951_s22 = sshll.u32 %s1441_s9, 2 }
  0x23   : > { %s952_s23 = sshll.u32 %s1445_s10, 3  ;;  %s281_s7 = scalar_lea.vmem [#allocation6], %s1587_s20 }
  0x24   : > { %s1594_s17 = scalar_select %p67_p7, %s1429_s29, %s69_s14  }
  0x25   : > { %s1596_s12 = sadd.s32 %s952_s23, %s951_s22  ;;  %s290_s13 = sshll.u32 %s281_s7, 4  ;;  %s1600_s13 = int_to_ptr.vmem [resolvable:$true] %s290_s13 }
  0x26   : > { %2040 = sst [smem:[#allocation27_spill]] %s1594_s17  ;;  %s1999_s30 = sshll.u32 %s1596_s12, 6 }
  0x27   : > { %s2041_s1 = sld [smem:[#allocation29_spill]]  ;;  %p1613_p8 = pnand %p2000_p5, %p1572_p3 }
  0x28   : > { %s2043_s7 = sand.u32 1, %s1449_s11  }
  0x29   : > { %s2042_s14 = scalar_select %p1613_p8, 1, 0 }
  0x2a   : > { %s1619_s21 = scalar_lea.sflag [#allocation7], %s2043_s7  ;;  %p1625_p10 = pneg %p1613_p8 }
  0x2d   : > { %s1607_s15 = scalar_lea.hbm %s2041_s1, %s1999_s30  ;;  %s1172_s23 = scalar_lea.hbm %s2041_s1, 1024 }
  0x2e   : > { %s1167_s22 = scalar_lea.hbm %s1607_s15, 256  ;;  %p1173_p13 = scmp.lt.u32.totalorder %s1607_s15, %s2041_s1 }
  0x2f   : > { %p1168_p9 = scmp.ne.s32.totalorder %s1607_s15, %s1167_s22  ;;  %p1174_p0 = scmp.lt.u32.totalorder %s1172_s23, %s1167_s22 }
  0x30   : > { %p1176_p3 = scmp.lt.u32.totalorder %s1167_s22, %s1607_s15 }
  0x31   : > { %p1170_p11 = pnand %p1625_p10, %p1168_p9  ;;  %p1175_p1 = por %p1174_p0, %p1173_p13 }
  0x33   : > { %p1171_p12 = pneg %p1170_p11  ;;  %p1177_p4 = por %p1176_p3, %p1175_p1 }
  0x35   : > { %p1178_p7 = pnand %p1177_p4, %p1171_p12 }
  0x37   : > { %1181 = shalt.err (!%p1178_p7)
}
  0x38   : > { %s1182_s7 = scalar_lea.vmem %s1600_s13, 256  ;;  %s1451_s16 = smov [#allocation6]  }
  0x39   : > { %p1183_p9 = scmp.ne.s32.totalorder %s1600_s13, %s1182_s7  ;;  %s1187_s18 = sshll.u32 %s1451_s16, 4  ;;  %s1188_s18 = int_to_ptr.vmem [resolvable:$false] %s1187_s18 }
  0x3a   : > { %s1189_s30 = scalar_lea.vmem %s1188_s18, 512  ;;  %p1190_p2 = scmp.lt.s32.totalorder %s1600_s13, %s1188_s18 }
  0x3b   : > { %p1185_p11 = pnand %p1183_p9, %p1625_p10  ;;  %p1191_p6 = scmp.lt.s32.totalorder %s1189_s30, %s1182_s7 }
  0x3d   : > { %p1186_p5 = pneg %p1185_p11  ;;  %p1192_p13 = por %p1191_p6, %p1190_p2 }
  0x3f   : > { %p1193_p0 = pnand %p1192_p13, %p1186_p5 }
  0x41   : > { %1196 = shalt.err (!%p1193_p0)
}
  0x42   : > { %s2013_s17 = smov 64   ;;  %s2015_s22 = smov 4  }
  0x43   : > { %1043 = dma.hbm_to_vmem [thread:$0]  (!%p1613_p8), %s1607_s15, 256, %s1600_s13, %s1619_s21, %s2013_s17, %s2013_s17, %s2015_s22  }
  0x44   : > { %s2045_s23 = sshll.u32 %s1596_s12, 6  ;;  %s2046_s2 = sld [smem:[#allocation30_spill]] }
  0x45   : > { %s304_s30 = scalar_lea.vmem [#allocation8], %s1587_s20  ;;  %s2047_s5 = sand.u32 1, %s1429_s29  }
  0x46   : > { %s313_s1 = sshll.u32 %s304_s30, 4  ;;  %s958_s8 = sshll.u32 %s2047_s5, 3  ;;  %s1660_s1 = int_to_ptr.vmem [resolvable:$true] %s313_s1 }
  0x47   : > { %s959_s4 = sshll.u32 %s1445_s10, 1  ;;  %s327_s24 = scalar_lea.vmem [#allocation9], %s958_s8 }
  0x48   : > { %s332_s0 = sadd.s32 %s1441_s9, %s959_s4  ;;  %s336_s25 = sshll.u32 %s327_s24, 4  ;;  %s337_s25 = int_to_ptr.vmem [resolvable:$true] %s336_s25 }
  0x49   : > { %s960_s19 = sshll.u32 %s332_s0, 7  ;;  %s2048_s3 = sld [smem:[#allocation31_spill]] }
  0x4a   : > { %s1657_s18 = scalar_lea.hbm %s2046_s2, %s2045_s23  ;;  %s2049_s20 = sand.u32 1, %s1449_s11  }
  0x4b   : > { %s1673_s15 = scalar_lea.sflag [#allocation10], %s2049_s20 }
  0x4f   : > { %s1669_s12 = scalar_lea.hbm %s2048_s3, %s960_s19  ;;  %s1202_s5 = scalar_lea.hbm %s2048_s3, 512 }
  0x50   : > { %s1197_s23 = scalar_lea.hbm %s1669_s12, 128  ;;  %p1203_p12 = scmp.lt.u32.totalorder %s1669_s12, %s2048_s3 }
  0x51   : > { %p1198_p2 = scmp.ne.s32.totalorder %s1669_s12, %s1197_s23  ;;  %p1204_p1 = scmp.lt.u32.totalorder %s1202_s5, %s1197_s23 }
  0x52   : > { %p1206_p4 = scmp.lt.u32.totalorder %s1197_s23, %s1669_s12 }
  0x53   : > { %p1200_p5 = pnand %p1198_p2, %p1625_p10  ;;  %p1205_p3 = por %p1204_p1, %p1203_p12 }
  0x55   : > { %p1201_p6 = pneg %p1200_p5  ;;  %p1207_p7 = por %p1206_p4, %p1205_p3 }
  0x57   : > { %p1208_p9 = pnand %p1207_p7, %p1201_p6 }
  0x59   : > { %1211 = shalt.err (!%p1208_p9)
}
  0x5a   : > { %s1212_s8 = scalar_lea.vmem %s337_s25, 128  ;;  %s1454_s19 = smov [#allocation9]  }
  0x5b   : > { %p1213_p11 = scmp.ne.s32.totalorder %s337_s25, %s1212_s8  ;;  %s1217_s7 = sshll.u32 %s1454_s19, 4  ;;  %s1218_s7 = int_to_ptr.vmem [resolvable:$false] %s1217_s7 }
  0x5c   : > { %s1219_s16 = scalar_lea.vmem %s1218_s7, 256  ;;  %p1220_p2 = scmp.lt.s32.totalorder %s337_s25, %s1218_s7 }
  0x5d   : > { %p1215_p13 = pnand %p1213_p11, %p1625_p10  ;;  %p1221_p5 = scmp.lt.s32.totalorder %s1219_s16, %s1212_s8 }
  0x5f   : > { %p1216_p0 = pneg %p1215_p13  ;;  %p1222_p8 = por %p1221_p5, %p1220_p2 }
  0x61   : > { %p1223_p1 = pnand %p1222_p8, %p1216_p0 }
  0x63   : > { %1226 = shalt.err (!%p1223_p1)
}
  0x64   : > { %p2050_p12 = scmp.ne.s32.totalorder %s2042_s14, 0  ;;  %s2051_s30 = sld [smem:[#allocation20_spill]] }
  0x65   : > { %s2052_s13 = sld [smem:[#allocation19_spill]]  ;;  %s2053_s20 = sld [smem:[#allocation18_spill]] }
  0x66   : > { %s2054_s23 = sld [smem:[#allocation26_spill]]  ;;  %s1694_s0 = sadd.s32 4294967295, %s1449_s11  }
  0x67   : > { %1049 = dma.hbm_to_vmem [thread:$0]  (!%p2050_p12), %s1669_s12, 128, %s337_s25, %s1673_s15  }
  0x68   : > { %s946_s4 = sadd.s32 4294967294, %s1449_s11   ;;  %p82_p8 = scmp.ne.s32.totalorder %s1425_s28, %s1421_s27 }
  0x69   : > { %p2011_p6 = scmp.eq.s32.totalorder %s1694_s0, 0  ;;  %p2057_p11 = scmp.eq.s32.totalorder %s1449_s11, 0 }
  0x6a   : > { %s151_s5 = sadd.s32 1, %s2051_s30  ;;  %p240_p2 = scmp.eq.s32.totalorder %s1694_s0, 3 }
  0x6b   : > { %p158_p3 = scmp.ne.s32.totalorder %s2051_s30, %s2052_s13  ;;  %p1705_p4 = por %p2011_p6, %p82_p8 }
  0x6c   : > { %p164_p7 = scmp.ne.s32.totalorder %s2052_s13, %s2053_s20  ;;  %p2056_p9 = scmp.eq.s32.totalorder %s2054_s23, 0 }
  0x6d   : > { %s2055_s24 = scalar_select %p1705_p4, 1, 0 }
  0x6e   : > { %s1714_s25 = scalar_select %p2056_p9, %s2051_s30, %s151_s5  }
  0x6f   : > { %p160_p13 = por %p158_p3, %p2057_p11  ;;  %p1720_p0 = por %p164_p7, %p2011_p6 }
  0x70   : > { %p246_p5 = scmp.eq.s32.totalorder %s946_s4, 3  ;;  %p947_p1 = scmp.ge.s32.totalorder %s1449_s11, 1 }
  0x71   : > { %s2058_s27 = scalar_select %p1720_p0, 1, 0 }
  0x72   : > { %p253_p8 = scmp.lt.s32.totalorder %s1449_s11, 5  ;;  %p1727_p4 = por %p240_p2, %p158_p3 }
  0x73   : > { %p1731_p9 = por %p246_p5, %p164_p7  ;;  %p2062_p6 = scmp.lt.s32.totalorder %s1449_s11, 4 }
  0x74   : > { %s2059_s12 = scalar_select %p1727_p4, 1, 0 }
  0x75   : > { %s2060_s26 = scalar_select %p1731_p9, 1, 0 }
  0x76   : > { %p1735_p11 = pnand %p947_p1, %p253_p8  ;;  %p1741_p0 = pnand %p2062_p6, %p160_p13 }
  0x77   : > { %s1455_s7 = smov [#allocation3]   ;;  %p2064_p7 = scmp.eq.s32.totalorder %s1694_s0, 0 }
  0x78   : > { %s2061_s8 = scalar_select %p1735_p11, 1, 0 }
  0x79   : > { %s2063_s19 = scalar_select %p1741_p0, 1, 0 }
  0x7a   : > { %p1036_p3 = pneg %p1735_p11  ;;  %s266_s16 = sshll.u32 %s1455_s7, 4  ;;  %s1747_s16 = int_to_ptr.vmem [resolvable:$true] %s266_s16 }
  0x7b   : > { %s345_s20 = sand.u32 1, %s2051_s30   ;;  %s1227_s23 = scalar_lea.hbm %s1657_s18, 256 }
  0x7c   : > { %p1751_p2 = pnand %p1036_p3, %p2064_p7  ;;  %p1228_p5 = scmp.ne.s32.totalorder %s1657_s18, %s1227_s23 }
  0x7d   : > { %s1232_s17 = scalar_lea.hbm %s2046_s2, 1024  ;;  %p1233_p13 = scmp.lt.u32.totalorder %s1657_s18, %s2046_s2 }
  0x7e   : > { %s2065_s13 = scalar_select %p1751_p2, 1, 0 }
  0x7f   : > { %p1230_p1 = pnand %p1228_p5, %p1625_p10  ;;  %p1234_p8 = scmp.lt.u32.totalorder %s1232_s17, %s1227_s23 }
  0x80   : > { %p1236_p3 = scmp.lt.u32.totalorder %s1227_s23, %s1657_s18 }
  0x81   : > { %p1231_p6 = pneg %p1230_p1  ;;  %p1235_p9 = por %p1234_p8, %p1233_p13 }
  0x83   : > { %p1237_p7 = por %p1236_p3, %p1235_p9 }
  0x85   : > { %p1238_p4 = pnand %p1237_p7, %p1231_p6 }
  0x87   : > { %1241 = shalt.err (!%p1238_p4)
}
  0x88   : > { %s1242_s7 = scalar_lea.vmem %s1660_s1, 256  ;;  %s1456_s4 = smov [#allocation8]  }
  0x89   : > { %p1243_p5 = scmp.ne.s32.totalorder %s1660_s1, %s1242_s7  ;;  %s1247_s5 = sshll.u32 %s1456_s4, 4  ;;  %s1248_s5 = int_to_ptr.vmem [resolvable:$false] %s1247_s5 }
  0x8a   : > { %s1249_s3 = scalar_lea.vmem %s1248_s5, 512  ;;  %p1250_p0 = scmp.lt.s32.totalorder %s1660_s1, %s1248_s5 }
  0x8b   : > { %p1245_p1 = pnand %p1243_p5, %p1625_p10  ;;  %p1251_p2 = scmp.lt.s32.totalorder %s1249_s3, %s1242_s7 }
  0x8d   : > { %p1246_p11 = pneg %p1245_p1  ;;  %p1252_p13 = por %p1251_p2, %p1250_p0 }
  0x8f   : > { %p1253_p8 = pnand %p1252_p13, %p1246_p11 }
  0x91   : > { %1256 = shalt.err (!%p1253_p8)
}
  0x92   : > { %s2066_s17 = smov 4   ;;  %s2067_s22 = smov 64  }
  0x93   : > { %1046 = dma.hbm_to_vmem [thread:$0]  (!%p2050_p12), %s1657_s18, 256, %s1660_s1, %s1619_s21, %s2067_s22, %s2067_s22, %s2066_s17  }
  0x94   : > { %s961_s6 = sshll.u32 %s345_s20, 4  ;;  %s2068_s5 = sld [smem:[#allocation28_spill]] }
  0x95   : > { %p2069_p4 = scmp.ne.s32.totalorder %s2065_s13, 0 }
  0x97   : > { %p1259_p0 = pneg %p2069_p4 }
  0x9a   : > { %s1257_s7 = scalar_lea.hbm %s2068_s5, 128 }
  0x9b   : > { %p1258_p10 = scmp.ne.s32.totalorder %s2068_s5, %s1257_s7  ;;  %p1264_p2 = scmp.lt.u32.totalorder %s1257_s7, %s2068_s5 }
  0x9d   : > { %p1260_p9 = pnand %p1259_p0, %p1258_p10 }
  0x9f   : > { %p1261_p11 = pneg %p1260_p9 }
  0xa1   : > { %p1266_p6 = pnand %p1264_p2, %p1261_p11 }
  0xa3   : > { %1269 = shalt.err (!%p1266_p6)
}
  0xa4   : > { %s1270_s1 = scalar_lea.vmem %s1747_s16, 128  ;;  %p1278_p5 = scmp.lt.s32.totalorder %s1747_s16, %s1747_s16 }
  0xa5   : > { %p1271_p12 = scmp.ne.s32.totalorder %s1747_s16, %s1270_s1  ;;  %p1279_p1 = scmp.lt.s32.totalorder %s1270_s1, %s1270_s1 }
  0xa7   : > { %p1273_p3 = pnand %p1271_p12, %p1259_p0  ;;  %p1280_p13 = por %p1279_p1, %p1278_p5 }
  0xa9   : > { %p1274_p7 = pneg %p1273_p3 }
  0xab   : > { %p1281_p8 = pnand %p1280_p13, %p1274_p7 }
  0xad   : > { %1284 = shalt.err (!%p1281_p8)
}
  0xae   : > { %1039 = dma.hbm_to_vmem [thread:$0]  (!%p2069_p4), %s2068_s5, 128, %s1747_s16, [#allocation4]  }
  0xaf   : > { %s988_s21 = sshll.u32 %s1445_s10, 8  ;;  %s2070_s20 = sld [smem:[#allocation32_spill]] }
  0xb0   : > { %s347_s4 = scalar_lea.vmem [#allocation11], %s961_s6  ;;  %p2071_p0 = scmp.ne.s32.totalorder %s2063_s19, 0 }
  0xb1   : > { %s354_s13 = sshll.u32 %s347_s4, 4  ;;  %s1810_s13 = int_to_ptr.vmem [resolvable:$true] %s354_s13 }
  0xb2   : > { %p1287_p9 = pneg %p2071_p0 }
  0xb5   : > { %s1808_s23 = scalar_lea.hbm %s2070_s20, %s988_s21  ;;  %s1290_s14 = scalar_lea.hbm %s2070_s20, 512 }
  0xb6   : > { %s1285_s7 = scalar_lea.hbm %s1808_s23, 256  ;;  %p1291_p2 = scmp.lt.u32.totalorder %s1808_s23, %s2070_s20 }
  0xb7   : > { %p1286_p10 = scmp.ne.s32.totalorder %s1808_s23, %s1285_s7  ;;  %p1292_p6 = scmp.lt.u32.totalorder %s1290_s14, %s1285_s7 }
  0xb8   : > { %p1294_p3 = scmp.lt.u32.totalorder %s1285_s7, %s1808_s23 }
  0xb9   : > { %p1288_p4 = pnand %p1287_p9, %p1286_p10  ;;  %p1293_p12 = por %p1292_p6, %p1291_p2 }
  0xbb   : > { %p1289_p11 = pneg %p1288_p4  ;;  %p1295_p7 = por %p1294_p3, %p1293_p12 }
  0xbd   : > { %p1296_p5 = pnand %p1295_p7, %p1289_p11 }
  0xbf   : > { %1299 = shalt.err (!%p1296_p5)
}
  0xc0   : > { %s1300_s6 = scalar_lea.vmem %s1810_s13, 256  ;;  %s1457_s9 = smov [#allocation11]  }
  0xc1   : > { %p1301_p1 = scmp.ne.s32.totalorder %s1810_s13, %s1300_s6  ;;  %s1305_s21 = sshll.u32 %s1457_s9, 4  ;;  %s1306_s21 = int_to_ptr.vmem [resolvable:$false] %s1305_s21 }
  0xc2   : > { %s1307_s18 = scalar_lea.vmem %s1306_s21, 512  ;;  %p1308_p10 = scmp.lt.s32.totalorder %s1810_s13, %s1306_s21 }
  0xc3   : > { %p1303_p13 = pnand %p1301_p1, %p1287_p9  ;;  %p1309_p4 = scmp.lt.s32.totalorder %s1307_s18, %s1300_s6 }
  0xc5   : > { %p1304_p8 = pneg %p1303_p13  ;;  %p1310_p2 = por %p1309_p4, %p1308_p10 }
  0xc7   : > { %p1311_p6 = pnand %p1310_p2, %p1304_p8 }
  0xc9   : > { %1314 = shalt.err (!%p1311_p6)
}
  0xca   : > { %1052 = dma.hbm_to_vmem [thread:$0]  (!%p2071_p0), %s1808_s23, 256, %s1810_s13, %s1673_s15, %s2067_s22, %s2067_s22, %s2066_s17  }
  0xcb   : > { %p2072_p9 = scmp.ne.s32.totalorder %s2061_s8, 0 }
  0xcc   : > { %p2073_p11 = scmp.eq.s32.totalorder (!%p2072_p9), %s1694_s0, 0 }
  0xcd   : > { %379 = sbr.rel (%p2072_p9) target bundleno = 1564 (0x61c), region = 48 }
  0xd4   : > { %1388 = dma.done.wait (%p2073_p11), [#allocation4], 128   ;;  %p2074_p12 = pmov %p2073_p11 }
  0xd5   : > { %s385_s19 = sand.u32 1, %s1694_s0   ;;  %s387_s30 = sand.u32 1, %s1425_s28  }
  0xd6   : > { %1390 = vsyncadd (%p2074_p12), [#allocation4], 4294967168  ;;  %s1849_s4 = sshll.u32 %s387_s30, 4  ;;  %s386_s7 = scalar_lea.sflag [#allocation7], %s385_s19 }
  0xd7   : > { %s389_s16 = scalar_lea.vmem [#allocation6], %s1849_s4  ;;  %p2075_p0 = scmp.ne.s32.totalorder %s2055_s24, 0 }
  0xd9   : > { %1392 = dma.done.wait (%p2075_p0), %s386_s7, 512  }
  0xda   : > { %1394 = vsyncadd (%p2075_p0), %s386_s7, 4294966784  ;;  %s1856_s15 = sshll.u32 %s387_s30, 3  ;;  %s398_s8 = scalar_lea.vmem [#allocation8], %s1849_s4 }
  0xdb   : > { %s404_s17 = scalar_lea.sflag [#allocation10], %s385_s19  ;;  %s407_s22 = scalar_lea.vmem [#allocation9], %s1856_s15 }
  0xdc   : > { %1396 = dma.done.wait (%p2075_p0), %s404_s17, 128  }
  0xdd   : > { %1398 = vsyncadd (%p2075_p0), %s404_s17, 4294967168  ;;  %s2076_s0 = sld [smem:[#allocation19_spill]]  ;;  %p2077_p3 = scmp.ne.s32.totalorder %s2058_s27, 0 }
  0xe3   : > { %s1865_s23 = sand.u32 1, %s2076_s0  }
  0xe4   : > { %s969_s13 = sshll.u32 %s1865_s23, 4 }
  0xe5   : > { %s1868_s3 = scalar_lea.vmem [#allocation11], %s969_s13 }
  0xe6   : > { %1400 = dma.done.wait (%p2077_p3), %s404_s17, 256  }
  0xe7   : > { %1402 = vsyncadd (%p2077_p3), %s404_s17, 4294967040  ;;  %s2078_s14 = sld [smem:[#allocation22_spill]]  ;;  %s970_s1 = sshll.u32 %s1865_s23, 3 }
  0xe8   : > { %s2079_s6 = sld [smem:[#allocation33_spill]]  ;;  %s2080_s30 = sld [smem:[#allocation34_spill]] }
  0xe9   : > { %s1889_s27 = scalar_lea.vmem [#allocation12], %s970_s1  ;;  %s2081_s17 = sld [smem:[#allocation21_spill]] }
  0xed   : > { %p469_p7 = scmp.lt.s32.totalorder %s2078_s14, 1 }
  0xef   : > { %s2110_s14 = smov (!%p469_p7, %s2078_s14), 1  ;;  %p972_p5 = scmp.ne.s32.totalorder %s2081_s17, 0 }
  0xf0   : > { %s471_s9 = scalar_lea.vmem %s2079_s6, %s2110_s14  ;;  %s971_s21 = sshll.u32 %s2110_s14, 1  ;;  %v483_v0 = vld [vmem:[#allocation3] sm:$0xff] (!%p972_p5)  ;;  %vm484_vm0 = vcmask (!%p972_p5), 261120  }
  0xf1   : > { %s1887_s7 = scalar_lea.vmem %s2080_s30, %s971_s21  ;;  %482 = sbr.rel (%p972_p5) target bundleno = 248 (0xf8), region = 72  ;;  %485 = vst.msk [vmem:[#allocation2] sm:$0xff] (!%p972_p5), %vm484_vm0, %v483_v0 }
  0xf8 PF: > { %v1157_v1 = vld [vmem:[%s389_s16] sm:$0xff]   ;;  %v1458_v2 = vmov 0.0   ;;  %v1158_v3 = vld [vmem:[%s389_s16 + $0x8] sm:$0xff]   ;;  %vm1459_vm1 = vmmov 0   ;;  %vm513_vm2 = vcmask 261120   ;;  %v497_v6 = vlaneseq  ;;  %s2082_s4 = sld [smem:[#allocation21_spill]] }
  0xf9   : > { %998 = vmatprep.subr.bf16.mxu0 %v1458_v2  ;;  %1006 = vmatprep.subr.bf16.mxu1 %v1458_v2  ;;  %v1896_v4 = vld [vmem:[#allocation2] sm:$0xff]  ;;  %v495_v9 = vld [vmem:[%s407_s22] sm:$0xff]  ;;  %v1160_v23 = vld [vmem:[%s398_s8 + $0x8] sm:$0xff]  }
  0xfa   : > { %999 = vmatpush3.bf16.msra.mxu0 %v1157_v1  ;;  %1002 = vmatprep.mubr.msk.bf16.mxu0 %vm1459_vm1, %v1458_v2  ;;  %v496_v5 = vpack.c.bf16 %v1896_v4, %v1896_v4  ;;  %v498_v7 = vshrl.u32 %v497_v6, 7  ;;  %v1159_v22 = vld [vmem:[%s398_s8] sm:$0xff]  }
  0xfb   : > { %1000 = vmatprep.subr.bf16.mxu0 %v1458_v2  ;;  %1010 = vmatprep.mubr.msk.bf16.mxu1 %vm1459_vm1, %v1458_v2 }
  0xfc   : > { %v499_v8 = vsub.s32 0, %v498_v7  ;;  %1007 = vmatpush3.bf16.msra.mxu1 %v1159_v22  ;;  %v573_v27 = vsub.s32 1, %v498_v7  ;;  %v578_v28 = vsub.s32 2, %v498_v7  ;;  %v585_v37 = vsub.s32 3, %v498_v7 }
  0xfd   : > { %1008 = vmatprep.subr.bf16.mxu1 %v1458_v2  ;;  %v657_v53 = vsub.s32 4, %v498_v7  ;;  %v662_v54 = vsub.s32 5, %v498_v7 }
  0xfe   : > { %1001 = vmatpush3.bf16.msra.mxu0 %v1158_v3  ;;  %v500_v10 = vrot.slane %v495_v9, %v499_v8  ;;  %v574_v29 = vrot.slane %v495_v9, %v573_v27  ;;  %v579_v32 = vrot.slane %v495_v9, %v578_v28  ;;  %v586_v38 = vrot.slane %v495_v9, %v585_v37  ;;  %p979_p1 = scmp.ne.s32.totalorder %s2082_s4, 1 }
  0xff   : > { %v658_v55 = vrot.slane %v495_v9, %v657_v53  ;;  %v663_v57 = vrot.slane %v495_v9, %v662_v54  ;;  %v1165_v63 = vld [vmem:[%s1868_s3] sm:$0xff] (!%p979_p1)   ;;  %v1460_v0 = vmov (!%p979_p1), 0.0   ;;  %v1166_v1 = vld [vmem:[%s1868_s3 + $0x8] sm:$0xff] (!%p979_p1)   ;;  %vm1461_vm3 = vmmov (!%p979_p1), 0  }
 0x100   : > { %1009 = vmatpush3.bf16.msra.mxu1 %v1160_v23  ;;  %1014 = vmatprep.subr.bf16.mxu0 (!%p979_p1), %v1460_v0  ;;  %v739_v3 = vld [vmem:[%s1887_s7] sm:$0x3] (!%p979_p1) }
 0x101   : > { %1003 = vmatmul.mubr.msk.bf16.vlgmr.msra.gmra.mrb[0].mxu0 %vm513_vm2, %v496_v5  ;;  %vm740_vm4 = vnez (!%p979_p1), %v739_v3  ;;  %v980_v7 = vld [vmem:[%s471_s9] ss:$0 sm:$0xff] (!%p979_p1) }
 0x102   : > { %1015 = vmatpush3.bf16.msra.mxu0 (!%p979_p1), %v1165_v63  ;;  %1018 = vmatprep.mubr.msk.bf16.mxu0 (!%p979_p1), %vm1461_vm3, %v1460_v0 }
 0x103   : > { %1016 = vmatprep.subr.bf16.mxu0 (!%p979_p1), %v1460_v0 }
 0x106   : > { %1017 = vmatpush3.bf16.msra.mxu0 (!%p979_p1), %v1166_v1 }
 0x1d4   : > { %v551_v11 = vpop.f32.mrb[0].mxu0 }
 0x1d5   : > { %v552_v12 = vadd.f32 %v551_v11, %v500_v10  ;;  %v1004_v13 = vpop.f32.mrb[1].mxu0 }
 0x1d6   : > { %v554_v14 = vpop.f32.mrb[2].mxu0 }
 0x1d7   : > { %v1005_v15 = vpop.f32.mrb[3].mxu0  ;;  %v557_v16 = vsel %vm513_vm2, %v552_v12, 0.0 }
 0x1d8   : > { %558 = vadd.xlane.f32.xlu0 %v557_v16 }
 0x265   : > { %v559_v17 = vpop.xlane.xlu0 %558 }
 0x266   : > { %v561_v18 = vmul.f32 0.03125, %v559_v17 }
 0x268   : > { %v562_v19 = vsub.f32 %v552_v12, %v561_v18 }
 0x26a   : > { %v563_v20 = vmul.f32 %v562_v19, %v562_v19 }
 0x26c   : > { %v564_v21 = vsel %vm513_vm2, %v563_v20, 0.0 }
 0x26d   : > { %565 = vadd.xlane.f32.xlu0 %v564_v21 }
 0x2fa   : > { %v566_v24 = vpop.xlane.xlu0 %565 }
 0x2fb   : > { %v567_v25 = vmul.f32 0.03125, %v566_v24 }
 0x2fd   : > { %v568_v26 = vadd.f32 1e-05, %v567_v25 }
 0x2ff   : > { %1161 = vrsqrt.f32 %v568_v26 }
 0x309   : > { %v1162_v30 = vpop.eup %1161 }
 0x30a   : > { %v570_v31 = vmul.f32 %v1162_v30, %v562_v19 }
 0x30c   : > { %v575_v33 = vmul.f32 %v574_v29, %v570_v31 }
 0x30e   : > { %v580_v34 = vadd.f32 %v579_v32, %v575_v33 }
 0x310   : > { %v581_v35 = vmax.f32 %v580_v34, 0.0 }
 0x312   : > { %v582_v36 = vpack.c.bf16 %v581_v35, %v581_v35 }
 0x314   : > { %1011 = vmatmul.mubr.msk.bf16.vlgmr.msra.gmra.mrb[0].mxu1 %vm513_vm2, %v582_v36 }
 0x3e7   : > { %v636_v39 = vpop.f32.mrb[0].mxu1 }
 0x3e8   : > { %v637_v40 = vadd.f32 %v636_v39, %v586_v38  ;;  %v1012_v41 = vpop.f32.mrb[1].mxu1 }
 0x3e9   : > { %v639_v42 = vpop.f32.mrb[2].mxu1 }
 0x3ea   : > { %v1013_v43 = vpop.f32.mrb[3].mxu1  ;;  %v642_v44 = vsel %vm513_vm2, %v637_v40, 0.0 }
 0x3eb   : > { %643 = vadd.xlane.f32.xlu1 %v642_v44 }
 0x478   : > { %v644_v45 = vpop.xlane.xlu1 %643 }
 0x479   : > { %v645_v46 = vmul.f32 0.03125, %v644_v45 }
 0x47b   : > { %v646_v47 = vsub.f32 %v637_v40, %v645_v46 }
 0x47d   : > { %v647_v48 = vmul.f32 %v646_v47, %v646_v47 }
 0x47f   : > { %v648_v49 = vsel %vm513_vm2, %v647_v48, 0.0 }
 0x480   : > { %649 = vadd.xlane.f32.xlu1 %v648_v49 }
 0x50d   : > { %v650_v50 = vpop.xlane.xlu1 %649 }
 0x50e   : > { %v651_v51 = vmul.f32 0.03125, %v650_v50 }
 0x510   : > { %v652_v52 = vadd.f32 1e-05, %v651_v51 }
 0x512   : > { %1163 = vrsqrt.f32 %v652_v52 }
 0x51c   : > { %v1164_v56 = vpop.eup %1163 }
 0x51d   : > { %v654_v58 = vmul.f32 %v1164_v56, %v646_v47 }
 0x51f   : > { %v659_v59 = vmul.f32 %v658_v55, %v654_v58 }
 0x521   : > { %v664_v60 = vadd.f32 %v663_v57, %v659_v59  ;;  %671 = sbr.rel (%p979_p1) target bundleno = 1537 (0x601), region = 76 }
 0x523   : > { %v665_v61 = vadd.f32 %v664_v60, %v1896_v4  ;;  %v1462_v4 = vmov (!%p979_p1), 0  }
 0x524   : > { %v741_v5 = vsel (!%p979_p1), %vm740_vm4, 16843009, %v1462_v4 }
 0x525   : > { %v666_v62 = vmax.f32 %v665_v61, 0.0  ;;  %v742_v6 = vunpack.c.0.s8 (!%p979_p1), %v741_v5 }
 0x527   : > { %667 = vst.msk [vmem:[#allocation2] sm:$0xff] %vm513_vm2, %v666_v62  ;;  %v676_v2 = vpack.c.bf16 (!%p979_p1), %v666_v62, %v666_v62  ;;  %vm743_vm5 = vcmp.ne.s32.totalorder (!%p979_p1), %v742_v6, 0 }
 0x529   : > { %1019 = vmatmul.mubr.msk.bf16.vlgmr.msra.gmra.mrb[0].mxu0 %vm513_vm2, %v676_v2 }
 0x5fc   : > { %v733_v8 = vpop.f32.mrb[0].mxu0 }
 0x5fd   : > { %v734_v9 = vadd.f32 %v980_v7, %v733_v8  ;;  %v1020_v10 = vpop.f32.mrb[1].mxu0 }
 0x5fe   : > { %v736_v11 = vpop.f32.mrb[2].mxu0 }
 0x5ff   : > { %v744_v12 = vsel %vm743_vm5, -1e+09, %v734_v9  ;;  %v1021_v13 = vpop.f32.mrb[3].mxu0 }
 0x600   : > { %745 = vst [vmem:[%s1889_s27] sm:$0xff] %v744_v12 }
 0x601 PF: > { %s2084_s22 = sld [smem:[#allocation22_spill]]  ;;  %s2085_s1 = sld [smem:[#allocation35_spill]] }
 0x602   : > { %s760_s14 = sshll.u32 %s1889_s27, 4  ;;  %s747_s2 = scalar_lea.sflag [#allocation5], %s1865_s23  ;;  %s761_s14 = int_to_ptr.vmem [resolvable:$true] %s760_s14 }
 0x603   : > { %s1315_s6 = scalar_lea.vmem %s761_s14, 128  ;;  %p2086_p8 = scmp.ne.s32.totalorder %s2059_s12, 0 }
 0x604   : > { %p1316_p13 = scmp.ne.s32.totalorder %s761_s14, %s1315_s6  ;;  %s1463_s9 = smov [#allocation12]  }
 0x605   : > { %s1319_s21 = sshll.u32 %s1463_s9, 4  ;;  %s1320_s21 = int_to_ptr.vmem [resolvable:$false] %s1319_s21 }
 0x606   : > { %p1317_p10 = pnand %p1316_p13, %p2086_p8  ;;  %s1321_s18 = scalar_lea.vmem %s1320_s21, 256 }
 0x607   : > { %s985_s0 = sshll.u32 %s2084_s22, 7  ;;  %p1322_p2 = scmp.lt.s32.totalorder %s761_s14, %s1320_s21 }
 0x608   : > { %s1929_s24 = scalar_lea.hbm %s2085_s1, %s985_s0  ;;  %p1318_p4 = pneg %p1317_p10 }
 0x609   : > { %p1323_p6 = scmp.lt.s32.totalorder %s1321_s18, %s1315_s6 }
 0x60b   : > { %p1324_p9 = por %p1323_p6, %p1322_p2 }
 0x60d   : > { %p1325_p11 = pnand %p1324_p9, %p1318_p4 }
 0x60f   : > { %1328 = shalt.err (!%p1325_p11)
}
 0x610   : > { %s1329_s23 = scalar_lea.hbm %s1929_s24, 128  ;;  %s1333_s7 = scalar_lea.hbm %s2085_s1, 256 }
 0x611   : > { %p1330_p12 = scmp.ne.s32.totalorder %s1929_s24, %s1329_s23  ;;  %p1334_p7 = scmp.lt.u32.totalorder %s1929_s24, %s2085_s1 }
 0x612   : > { %p1335_p5 = scmp.lt.u32.totalorder %s1333_s7, %s1329_s23  ;;  %p1337_p13 = scmp.lt.u32.totalorder %s1329_s23, %s1929_s24 }
 0x613   : > { %p1331_p0 = pnand %p1330_p12, %p2086_p8 }
 0x614   : > { %p1336_p1 = por %p1335_p5, %p1334_p7 }
 0x615   : > { %p1332_p3 = pneg %p1331_p0 }
 0x616   : > { %p1338_p10 = por %p1337_p13, %p1336_p1 }
 0x618   : > { %p1339_p4 = pnand %p1338_p10, %p1332_p3 }
 0x61a   : > { %1342 = shalt.err (!%p1339_p4)
}
 0x61b   : > { %1034 = dma.vmem_to_hbm [thread:$0]  (%p2086_p8), %s761_s14, 128, %s1929_s24, %s747_s2  }
 0x61c PF: > { %s2087_s4 = sld [smem:[#allocation18_spill]]  ;;  %p1060_p2 = scmp.ge.s32.totalorder %s1449_s11, 2 }
 0x61d   : > { %p2088_p6 = scmp.ne.s32.totalorder %s2060_s26, 0 }
 0x61f   : > { %p1054_p9 = pnand %p1060_p2, %p2088_p6 }
 0x622   : > { %s772_s16 = sand.u32 1, %s2087_s4  }
 0x623   : > { %s773_s15 = scalar_lea.sflag [#allocation5], %s772_s16 }
 0x624   : > { %1404 = dma.done.wait (!%p1054_p9), %s773_s15, 128  }
 0x625   : > { %1406 = vsyncadd (!%p1054_p9), %s773_s15, 4294967168  ;;  %s27_s11 = sadd.s32 1, %s1449_s11   ;;  %s2089_s24 = sld [smem:[#allocation19_spill]] }
 0x626   : > { %p24_p11 = scmp.ge.s32.totalorder %s27_s11, 6   ;;  %s2090_s8 = sld [smem:[#allocation20_spill]] }
 0x627   : > { %s2091_s22 = smov %s1714_s25  ;;  %s2092_s12 = sld [smem:[#allocation27_spill]] }
 0x628   : > { %s2093_s30 = sld [smem:[#allocation23_spill]]  ;;  %s2094_s9 = sld [smem:[#allocation24_spill]] }
 0x629   : > { %s2095_s0 = sld [smem:[#allocation25_spill]]  ;;  %s2097_s26 = smov %s2091_s22 }
 0x62a   : > { %s2098_s27 = smov %s1425_s28  ;;  %s2099_s28 = smov %s1429_s29 }
 0x62b   :  { %26 = sbr.rel (!%p24_p11) target bundleno = 21 (0x15), region = 147 }
 0x62c   : > { %s2096_s25 = smov %s2090_s8  ;;  %s2101_s8 = smov %s1445_s10 }
 0x62d   : > { %s2100_s29 = smov %s2092_s12 }
 0x62f   : > { %s2102_s10 = smov %s2095_s0 }
 0x632   :  { %778 = vsyncpa [#allocation4], 1 }
 0x633   :  { %780 = vsyncpa [#allocation4 + $0x1], 1 }
 0x634   :  { %781 = vsyncpa [#allocation7], 1 }
 0x635   :  { %783 = vsyncpa [#allocation7 + $0x1], 1 }
 0x636   :  { %784 = vsyncpa [#allocation10], 1 }
 0x637   :  { %786 = vsyncpa [#allocation10 + $0x1], 1 }
 0x638   :  { %787 = vsyncpa [#allocation5], 1 }
 0x639   :  { %789 = vsyncpa [#allocation5 + $0x1], 1 }

</bundles_post_ra>
